<compile_context>
chip_gen: v7x
topology: tpu7x:2x2x1
jax: 0.10.0
libtpu: 0.0.40
codegen_flags: <defaults>
</compile_context>

<pallas_src>
import jax
import jax.numpy as jnp
from jax.experimental import pallas as pl
from jax.experimental.pallas import tpu as pltpu

# ---------------------------------------------------------------------------
# Model hyper-parameters (small, consistent with the module's forward pass)
# ---------------------------------------------------------------------------
NUM_CLASSES = 20
ANCHOR_LIST = jnp.array(
    [[1.0, 1], [2, 2], [3, 3], [4, 4], [5, 5], [2, 3], [3, 2], [3, 5], [5, 3]],
    dtype=jnp.float32,
)
NUM_ANCHORS = ANCHOR_LIST.shape[0]        # A = 9
IN_DIM = 64                               # stand-in for the 1280 backbone channels
HIDDEN_DIM = 32                           # stand-in for 128
FEAT_H = FEAT_W = 4                       # stand-in for the 7x7 feature map
DOUT = 5 * NUM_ANCHORS + NUM_CLASSES      # 65
DOUT_PAD = 128                            # head output padded to one lane-dense tile
Q = NUM_ANCHORS * FEAT_H * FEAT_W         # 144 anchors per image
Q_PAD = 256                               # IoU lane dim padded to a multiple of 128
NEG_THRESH = 0.2                          # TODO(synk): unused (reference sampler approximated)


# ---------------------------------------------------------------------------
# Kernel: fused prediction head (backbone folded into conv1) + activations + IoU
#   Single block: all B*H*W rows and all B*N GT boxes processed in one grid step.
# ---------------------------------------------------------------------------
def _fused_compute_kernel(x_ref, w1_ref, b1_ref, w2_ref, b2_ref,
                          m_raw_ref, m_act_ref, m_shift_ref,
                          anc_ref, gt_ref, pred_ref, iou_ref):
    # ---- prediction head: conv1x1 -> (Dropout=identity) -> LeakyReLU -> conv1x1 ----
    # TODO(synk): nn.Dropout(0.3) treated as identity (eval mode) for determinism.
    h = jnp.dot(x_ref[...].astype(jnp.bfloat16), w1_ref[...],
                preferred_element_type=jnp.float32) + b1_ref[...]      # (P, HIDDEN)
    h = jnp.where(h > 0, h, 0.01 * h)                 # LeakyReLU(negative_slope=0.01)
    pred = jnp.dot(h.astype(jnp.bfloat16), w2_ref[...],
                   preferred_element_type=jnp.float32) + b2_ref[...]   # (P, DOUT_PAD)

    # ---- per-channel activation via precomputed 0/1 masks ----
    #   conf channels -> sigmoid; tx,ty -> sigmoid - 0.5; tw,th/class/pad -> raw
    sig = pl.reciprocal(1.0 + jnp.exp(-pred), approx=True)             # EUP exp + rcp
    pred_ref[...] = (pred * m_raw_ref[...] + sig * m_act_ref[...]
                     - 0.5 * m_shift_ref[...])

    # ---- IoU: rows = (b, n) GT pairs (pre-broadcast planes), lanes = Q anchors ----
    a = anc_ref[...]                                  # (8, Q_PAD): px1,py1,px2,py2,area_p,pad
    gx1 = gt_ref[0]                                   # (BN_PAD, Q_PAD)
    gy1 = gt_ref[1]
    gx2 = gt_ref[2]
    gy2 = gt_ref[3]
    area_g = gt_ref[4]
    iw = jnp.maximum(jnp.minimum(gx2, a[2:3, :]) - jnp.maximum(gx1, a[0:1, :]), 0.0)
    ih = jnp.maximum(jnp.minimum(gy2, a[3:4, :]) - jnp.maximum(gy1, a[1:2, :]), 0.0)
    inter = iw * ih                                   # (BN_PAD, Q_PAD)
    union = a[4:5, :] + area_g - inter
    iou_ref[...] = inter / jnp.maximum(union, 1e-8)   # epsilon guard for padded boxes


def fused_compute_pallas(x_pool, anc_planes, gt_planes, masks, params):
    """x_pool (B*H*W, 3), anc_planes (8, Q_PAD), gt_planes (5, BN_PAD, Q_PAD) ->
       pred (B*H*W, DOUT_PAD), iou (BN_PAD, Q_PAD)."""
    m_raw, m_act, m_shift = masks
    p_rows = x_pool.shape[0]
    bn_pad, q_pad = gt_planes.shape[1], gt_planes.shape[2]
    # Single block, no grid: every operand is DMA'd to VMEM exactly once
    # (working set ~60 KB, far below VMEM on every TPU generation).
    return pl.pallas_call(
        _fused_compute_kernel,
        out_shape=(
            jax.ShapeDtypeStruct((p_rows, DOUT_PAD), jnp.float32),
            jax.ShapeDtypeStruct((bn_pad, q_pad), jnp.float32),
        ),
    )(x_pool, params["w1_eff"], params["b1_eff"], params["w2"], params["b2"],
      m_raw, m_act, m_shift, anc_planes, gt_planes)


# ---------------------------------------------------------------------------
# Detector glue (plain JAX; cheap, data-dependent, or index arithmetic only)
# ---------------------------------------------------------------------------
def generate_grid(B, H, W):
    w_range = jnp.arange(W, dtype=jnp.float32) + 0.5
    h_range = jnp.arange(H, dtype=jnp.float32) + 0.5
    w_grid = jnp.tile(w_range[None, :], (H, 1))
    h_grid = jnp.tile(h_range[:, None], (1, W))
    grid = jnp.stack([w_grid, h_grid], axis=-1)          # (H, W, 2) in (x, y)
    return jnp.broadcast_to(grid[None], (B, H, W, 2))


def generate_anchor(anc, grid):
    x = grid[..., 0][:, None]                            # (B, 1, H, W)
    y = grid[..., 1][:, None]
    w = anc[:, 0][None, :, None, None]                   # (1, A, 1, 1)
    h = anc[:, 1][None, :, None, None]
    return jnp.stack([x - w / 2, y - h / 2, x + w / 2, y + h / 2], axis=-1)


def reference_on_activated_anchors(anc_flat, bboxes, iou_t):
    # TODO(synk): ReferenceOnActivatedAnchors was not provided; static-shape
    # approximation (one positive anchor per GT via argmax IoU, the M lowest
    # max-IoU anchors as negatives; NEG_THRESH is not applied).
    B, Qn, _ = anc_flat.shape
    best = jnp.argmax(iou_t, axis=2)                                 # (B, N)
    GT_conf = jnp.max(iou_t, axis=2).reshape(-1)                     # (M,)
    pos_idx = (jnp.arange(B)[:, None] * Qn + best).reshape(-1)       # (M,)

    pos_anc = anc_flat.reshape(-1, 4)[pos_idx]                       # (M, 4)
    gt = bboxes.reshape(-1, 5)                                       # (M, 5)
    xc_a = (pos_anc[:, 0] + pos_anc[:, 2]) / 2
    yc_a = (pos_anc[:, 1] + pos_anc[:, 3]) / 2
    wa = pos_anc[:, 2] - pos_anc[:, 0]
    ha = pos_anc[:, 3] - pos_anc[:, 1]
    xc_g = (gt[:, 0] + gt[:, 2]) / 2
    yc_g = (gt[:, 1] + gt[:, 3]) / 2
    wg = gt[:, 2] - gt[:, 0]
    hg = gt[:, 3] - gt[:, 1]
    GT_offsets = jnp.stack(
        [xc_g - xc_a, yc_g - yc_a, jnp.log(wg / wa), jnp.log(hg / ha)], axis=-1)
    GT_class = gt[:, 4].astype(jnp.int32)

    max_iou = jnp.max(iou_t, axis=1).reshape(-1)                     # (B*Q,)
    M = pos_idx.shape[0]
    neg_idx = jnp.argsort(max_iou)[:M]
    return pos_idx, neg_idx, GT_conf, GT_offsets, GT_class


def detection_losses(conf_scores, offsets, GT_offsets, class_prob, GT_class,
                     pos_idx, B, Qn):
    """Loss epilogue in plain JAX (XLA fuses it); w_conf = w_reg = w_cls = 1."""
    M = offsets.shape[0]
    # ConfScoreRegression: first half targets 1, second half targets 0
    tgt = jnp.concatenate([jnp.ones((M, 1), jnp.float32),
                           jnp.zeros((M, 1), jnp.float32)], axis=0)
    conf_loss = jnp.sum((conf_scores - tgt) ** 2) / (2 * M)
    # BboxRegression
    reg_loss = jnp.sum((offsets - GT_offsets) ** 2) / M
    # ObjectClassification: per-row CE, per-image mean, then batch mean
    mx = jnp.max(class_prob, axis=-1, keepdims=True)
    lse = mx + jnp.log(jnp.sum(jnp.exp(class_prob - mx), axis=-1, keepdims=True))
    ce = (lse - jnp.take_along_axis(class_prob, GT_class[:, None], axis=-1))[:, 0]
    seg = pos_idx // Qn
    counts = jnp.sum((seg[:, None] == jnp.arange(B)[None, :]).astype(jnp.float32),
                     axis=0)
    cls_loss = jnp.sum(ce / (B * counts[seg]))
    return conf_loss + reg_loss + cls_loss


def single_stage_detector_forward(images, bboxes, params):
    """Training-time forward pass -> scalar total loss."""
    B = images.shape[0]
    H, W, A, C = FEAT_H, FEAT_W, NUM_ANCHORS, NUM_CLASSES
    N = bboxes.shape[1]
    BN = B * N
    BN_PAD = max(8, ((BN + 7) // 8) * 8)

    # TODO(synk): FeatureExtractor (MobileNetV2 -> (B,1280,7,7)) is not defined in the
    # reference; deterministic stand-in = patch average pool, then a linear layer that
    # has been folded into conv1 of the prediction head (w1_eff / b1_eff).
    Cimg, Hi, Wi = images.shape[1], images.shape[2], images.shape[3]
    pooled = images.reshape(B, Cimg, H, Hi // H, W, Wi // W).mean(axis=(3, 5))
    x_pool = jnp.transpose(pooled, (0, 2, 3, 1)).reshape(B * H * W, Cimg)  # (B*H*W, 3)

    grid = generate_grid(B, H, W)
    anchors = generate_anchor(ANCHOR_LIST, grid)                     # (B, A, H, W, 4)
    anc_flat = anchors.reshape(B, Q, 4)

    # grid-invariant anchor planes: px1, py1, px2, py2, area_p; lane-padded to Q_PAD
    a0 = anc_flat[0]                                                 # (Q, 4)
    area_p = (a0[:, 2] - a0[:, 0]) * (a0[:, 3] - a0[:, 1])
    anc_planes = jnp.concatenate([a0.T, area_p[None, :]], axis=0)    # (5, Q)
    anc_planes = jnp.pad(anc_planes, ((0, 3), (0, Q_PAD - Q)))       # (8, Q_PAD)

    # GT planes pre-broadcast in the wrapper (avoids in-kernel lane broadcasts)
    g = bboxes.reshape(BN, 5)
    area_g = (g[:, 2] - g[:, 0]) * (g[:, 3] - g[:, 1])
    gt_p = jnp.concatenate([g[:, :4].T, area_g[None, :]], axis=0)    # (5, BN)
    gt_p = jnp.pad(gt_p, ((0, 0), (0, BN_PAD - BN)))                 # (5, BN_PAD)
    gt_planes = jnp.broadcast_to(gt_p[:, :, None], (5, BN_PAD, Q_PAD))

    # per-output-channel 0/1 activation masks (raw / sigmoid / shift-by-0.5)
    col = jnp.arange(DOUT_PAD)
    in_anchor = col < 5 * A
    rel = col % 5
    m_act = (in_anchor & (rel < 3)).astype(jnp.float32)[None, :]     # conf, tx, ty
    m_shift = (in_anchor & (rel >= 1) & (rel < 3)).astype(jnp.float32)[None, :]
    m_raw = 1.0 - m_act

    pred_flat, iou_pad = fused_compute_pallas(
        x_pool, anc_planes, gt_planes, (m_raw, m_act, m_shift), params)
    iou_t = iou_pad[:BN, :Q].reshape(B, N, Q)                        # drop zero padding

    pos_idx, neg_idx, GT_conf, GT_offsets, GT_class = reference_on_activated_anchors(
        anc_flat, bboxes, iou_t)

    # ---- extract pos/neg anchor predictions (data-dependent gathers; XLA glue) ----
    pred_nhwc = pred_flat.reshape(B, H, W, DOUT_PAD)
    anch = pred_nhwc[..., :5 * A].reshape(B, H, W, A, 5)
    anch = jnp.transpose(anch, (0, 3, 1, 2, 4)).reshape(-1, 5)       # (B*A*H*W, 5)
    pos = anch[pos_idx]
    neg = anch[neg_idx]
    conf_scores = jnp.concatenate([pos[:, 0:1], neg[:, 0:1]], axis=0)  # (2M, 1)
    offsets = pos[:, 1:]                                               # (M, 4)

    cls_sc = pred_nhwc[..., 5 * A:5 * A + C]                           # (B, H, W, C)
    cls_sc = jnp.broadcast_to(cls_sc[:, None], (B, A, H, W, C)).reshape(-1, C)
    class_prob = cls_sc[pos_idx]                                       # (M, C)

    return detection_losses(conf_scores, offsets, GT_offsets, class_prob, GT_class,
                            pos_idx, B, Q)


# ---------------------------------------------------------------------------
# Deterministic parameter / input construction and smoke test
# ---------------------------------------------------------------------------
def init_params(key):
    ks = jax.random.split(key, 6)
    wb = 0.1 * jax.random.normal(ks[0], (3, IN_DIM), jnp.float32)
    bb = 0.01 * jax.random.normal(ks[1], (1, IN_DIM), jnp.float32)
    w1 = 0.1 * jax.random.normal(ks[2], (IN_DIM, HIDDEN_DIM), jnp.float32)
    b1 = 0.01 * jax.random.normal(ks[3], (1, HIDDEN_DIM), jnp.float32)
    w2 = 0.1 * jax.random.normal(ks[4], (HIDDEN_DIM, DOUT), jnp.float32)
    b2 = 0.01 * jax.random.normal(ks[5], (DOUT,), jnp.float32)
    # fold the linear backbone stand-in into conv1 (dropout=identity, no nonlinearity
    # between them): w1_eff = wb @ w1, b1_eff = bb @ w1 + b1
    w1_eff = (wb @ w1).astype(jnp.bfloat16)                           # (3, HIDDEN)
    b1_eff = bb @ w1 + b1                                             # (1, HIDDEN)
    return {
        "w1_eff": w1_eff,
        "b1_eff": b1_eff,
        # lane-dense head: zero-pad Dout 65 -> 128 (padding never read downstream)
        "w2": jnp.zeros((HIDDEN_DIM, DOUT_PAD), jnp.float32).at[:, :DOUT].set(w2
               ).astype(jnp.bfloat16),
        "b2": jnp.zeros((1, DOUT_PAD), jnp.float32).at[:, :DOUT].set(b2),
    }


if __name__ == "__main__":
    key = jax.random.PRNGKey(0)
    k_img, k_xy, k_wh, k_cls, k_par = jax.random.split(key, 5)

    B, N = 2, 3
    images = jax.random.normal(k_img, (B, 3, 16, 16), jnp.float32)

    # GT boxes in feature-map coordinates ([0, 4] range), last column = class id.
    tl = jax.random.uniform(k_xy, (B, N, 2), minval=0.0, maxval=2.5)
    wh = jax.random.uniform(k_wh, (B, N, 2), minval=0.5, maxval=1.5)
    cls = jax.random.randint(k_cls, (B, N, 1), 0, NUM_CLASSES).astype(jnp.float32)
    bboxes = jnp.concatenate([tl, tl + wh, cls], axis=-1)             # (B, N, 5)

    params = init_params(k_par)

    total_loss = jax.jit(single_stage_detector_forward)(images, bboxes, params)
    jax.block_until_ready(total_loss)
    assert total_loss.shape == () and jnp.isfinite(total_loss)
    print("KERNEL_OK")
</pallas_src>

<mosaic_0001>
module attributes {stable_mosaic.version = 11 : i64} {
  func.func @_fused_compute_kernel(%arg0: memref<32x3xf32, #tpu.memory_space<vmem>>, %arg1: memref<3x32xbf16, #tpu.memory_space<vmem>>, %arg2: memref<1x32xf32, #tpu.memory_space<vmem>>, %arg3: memref<32x128xbf16, #tpu.memory_space<vmem>>, %arg4: memref<1x128xf32, #tpu.memory_space<vmem>>, %arg5: memref<1x128xf32, #tpu.memory_space<vmem>>, %arg6: memref<1x128xf32, #tpu.memory_space<vmem>>, %arg7: memref<1x128xf32, #tpu.memory_space<vmem>>, %arg8: memref<8x256xf32, #tpu.memory_space<vmem>>, %arg9: memref<5x8x256xf32, #tpu.memory_space<vmem>>, %arg10: memref<32x128xf32, #tpu.memory_space<vmem>>, %arg11: memref<8x256xf32, #tpu.memory_space<vmem>>) attributes {dimension_semantics = [], scalar_prefetch = 0 : i64, scratch_operands = 0 : i64, tpu.core_type = #tpu.core_type<tc>} {
    %c0 = arith.constant 0 : index
    %c0_0 = arith.constant 0 : index
    %0 = vector.load %arg0[%c0, %c0_0] : memref<32x3xf32, #tpu.memory_space<vmem>>, vector<32x3xf32>
    %1 = arith.truncf %0 : vector<32x3xf32> to vector<32x3xbf16>
    %c0_1 = arith.constant 0 : index
    %c0_2 = arith.constant 0 : index
    %2 = vector.load %arg1[%c0_1, %c0_2] : memref<3x32xbf16, #tpu.memory_space<vmem>>, vector<3x32xbf16>
    %cst = arith.constant dense<0.000000e+00> : vector<32x32xf32>
    %3 = tpu.matmul %1, %2, %cst {dimension_numbers = #tpu.dot_dimension_numbers<[1], [0], [0], [1], [0, 0, 1, 1], [], []>} : vector<32x3xbf16>, vector<3x32xbf16>, vector<32x32xf32> -> vector<32x32xf32>
    %c0_3 = arith.constant 0 : index
    %c0_4 = arith.constant 0 : index
    %4 = vector.load %arg2[%c0_3, %c0_4] : memref<1x32xf32, #tpu.memory_space<vmem>>, vector<1x32xf32>
    %5 = vector.broadcast %4 : vector<1x32xf32> to vector<32x32xf32>
    %6 = arith.addf %3, %5 : vector<32x32xf32>
    %cst_5 = arith.constant 0.000000e+00 : f32
    %7 = vector.broadcast %cst_5 : f32 to vector<32x32xf32>
    %8 = arith.cmpf ogt, %6, %7 : vector<32x32xf32>
    %cst_6 = arith.constant 0.00999999977 : f32
    %9 = vector.broadcast %cst_6 : f32 to vector<32x32xf32>
    %10 = arith.mulf %9, %6 : vector<32x32xf32>
    %11 = arith.select %8, %6, %10 : vector<32x32xi1>, vector<32x32xf32>
    %12 = arith.truncf %11 : vector<32x32xf32> to vector<32x32xbf16>
    %c0_7 = arith.constant 0 : index
    %c0_8 = arith.constant 0 : index
    %13 = vector.load %arg3[%c0_7, %c0_8] : memref<32x128xbf16, #tpu.memory_space<vmem>>, vector<32x128xbf16>
    %cst_9 = arith.constant dense<0.000000e+00> : vector<32x128xf32>
    %14 = tpu.matmul %12, %13, %cst_9 {dimension_numbers = #tpu.dot_dimension_numbers<[1], [0], [0], [1], [0, 0, 1, 1], [], []>} : vector<32x32xbf16>, vector<32x128xbf16>, vector<32x128xf32> -> vector<32x128xf32>
    %c0_10 = arith.constant 0 : index
    %c0_11 = arith.constant 0 : index
    %15 = vector.load %arg4[%c0_10, %c0_11] : memref<1x128xf32, #tpu.memory_space<vmem>>, vector<1x128xf32>
    %16 = vector.broadcast %15 : vector<1x128xf32> to vector<32x128xf32>
    %17 = arith.addf %14, %16 : vector<32x128xf32>
    %cst_12 = arith.constant 0.000000e+00 : f32
    %18 = vector.broadcast %cst_12 : f32 to vector<32x128xf32>
    %19 = arith.subf %18, %17 : vector<32x128xf32>
    %20 = math.exp %19 : vector<32x128xf32>
    %cst_13 = arith.constant 1.000000e+00 : f32
    %21 = vector.broadcast %cst_13 : f32 to vector<32x128xf32>
    %22 = arith.addf %21, %20 : vector<32x128xf32>
    %23 = tpu.reciprocal %22 {approx = true} : vector<32x128xf32> -> vector<32x128xf32>
    %c0_14 = arith.constant 0 : index
    %c0_15 = arith.constant 0 : index
    %24 = vector.load %arg5[%c0_14, %c0_15] : memref<1x128xf32, #tpu.memory_space<vmem>>, vector<1x128xf32>
    %25 = vector.broadcast %24 : vector<1x128xf32> to vector<32x128xf32>
    %26 = arith.mulf %17, %25 : vector<32x128xf32>
    %c0_16 = arith.constant 0 : index
    %c0_17 = arith.constant 0 : index
    %27 = vector.load %arg6[%c0_16, %c0_17] : memref<1x128xf32, #tpu.memory_space<vmem>>, vector<1x128xf32>
    %28 = vector.broadcast %27 : vector<1x128xf32> to vector<32x128xf32>
    %29 = arith.mulf %23, %28 : vector<32x128xf32>
    %30 = arith.addf %26, %29 : vector<32x128xf32>
    %c0_18 = arith.constant 0 : index
    %c0_19 = arith.constant 0 : index
    %31 = vector.load %arg7[%c0_18, %c0_19] : memref<1x128xf32, #tpu.memory_space<vmem>>, vector<1x128xf32>
    %cst_20 = arith.constant 5.000000e-01 : f32
    %32 = vector.broadcast %cst_20 : f32 to vector<1x128xf32>
    %33 = arith.mulf %32, %31 : vector<1x128xf32>
    %34 = vector.broadcast %33 : vector<1x128xf32> to vector<32x128xf32>
    %35 = arith.subf %30, %34 : vector<32x128xf32>
    %c0_21 = arith.constant 0 : index
    %c0_22 = arith.constant 0 : index
    %36 = vector.load %arg10[%c0_21, %c0_22] : memref<32x128xf32, #tpu.memory_space<vmem>>, vector<32x128xf32>
    tpu.vector_store %arg10[%c0_21, %c0_22], %35 {strides = array<i32>} : memref<32x128xf32, #tpu.memory_space<vmem>>, vector<32x128xf32>,
    %c0_23 = arith.constant 0 : index
    %c0_24 = arith.constant 0 : index
    %37 = vector.load %arg8[%c0_23, %c0_24] : memref<8x256xf32, #tpu.memory_space<vmem>>, vector<8x256xf32>
    %c0_25 = arith.constant 0 : index
    %c0_26 = arith.constant 0 : index
    %c0_27 = arith.constant 0 : index
    %38 = vector.load %arg9[%c0_25, %c0_26, %c0_27] : memref<5x8x256xf32, #tpu.memory_space<vmem>>, vector<1x8x256xf32>
    %39 = vector.shape_cast %38 : vector<1x8x256xf32> to vector<8x256xf32>
    %c1 = arith.constant 1 : index
    %c0_28 = arith.constant 0 : index
    %c0_29 = arith.constant 0 : index
    %40 = vector.load %arg9[%c1, %c0_28, %c0_29] : memref<5x8x256xf32, #tpu.memory_space<vmem>>, vector<1x8x256xf32>
    %41 = vector.shape_cast %40 : vector<1x8x256xf32> to vector<8x256xf32>
    %c2 = arith.constant 2 : index
    %c0_30 = arith.constant 0 : index
    %c0_31 = arith.constant 0 : index
    %42 = vector.load %arg9[%c2, %c0_30, %c0_31] : memref<5x8x256xf32, #tpu.memory_space<vmem>>, vector<1x8x256xf32>
    %43 = vector.shape_cast %42 : vector<1x8x256xf32> to vector<8x256xf32>
    %c3 = arith.constant 3 : index
    %c0_32 = arith.constant 0 : index
    %c0_33 = arith.constant 0 : index
    %44 = vector.load %arg9[%c3, %c0_32, %c0_33] : memref<5x8x256xf32, #tpu.memory_space<vmem>>, vector<1x8x256xf32>
    %45 = vector.shape_cast %44 : vector<1x8x256xf32> to vector<8x256xf32>
    %c4 = arith.constant 4 : index
    %c0_34 = arith.constant 0 : index
    %c0_35 = arith.constant 0 : index
    %46 = vector.load %arg9[%c4, %c0_34, %c0_35] : memref<5x8x256xf32, #tpu.memory_space<vmem>>, vector<1x8x256xf32>
    %47 = vector.shape_cast %46 : vector<1x8x256xf32> to vector<8x256xf32>
    %48 = vector.extract_strided_slice %37 {offsets = [2, 0], sizes = [1, 256], strides = [1, 1]} : vector<8x256xf32> to vector<1x256xf32>
    %49 = vector.broadcast %48 : vector<1x256xf32> to vector<8x256xf32>
    %50 = arith.minimumf %43, %49 : vector<8x256xf32>
    %51 = vector.extract_strided_slice %37 {offsets = [0, 0], sizes = [1, 256], strides = [1, 1]} : vector<8x256xf32> to vector<1x256xf32>
    %52 = vector.broadcast %51 : vector<1x256xf32> to vector<8x256xf32>
    %53 = arith.maximumf %39, %52 : vector<8x256xf32>
    %54 = arith.subf %50, %53 : vector<8x256xf32>
    %cst_36 = arith.constant 0.000000e+00 : f32
    %55 = vector.broadcast %cst_36 : f32 to vector<8x256xf32>
    %56 = arith.maximumf %54, %55 : vector<8x256xf32>
    %57 = vector.extract_strided_slice %37 {offsets = [3, 0], sizes = [1, 256], strides = [1, 1]} : vector<8x256xf32> to vector<1x256xf32>
    %58 = vector.broadcast %57 : vector<1x256xf32> to vector<8x256xf32>
    %59 = arith.minimumf %45, %58 : vector<8x256xf32>
    %60 = vector.extract_strided_slice %37 {offsets = [1, 0], sizes = [1, 256], strides = [1, 1]} : vector<8x256xf32> to vector<1x256xf32>
    %61 = vector.broadcast %60 : vector<1x256xf32> to vector<8x256xf32>
    %62 = arith.maximumf %41, %61 : vector<8x256xf32>
    %63 = arith.subf %59, %62 : vector<8x256xf32>
    %cst_37 = arith.constant 0.000000e+00 : f32
    %64 = vector.broadcast %cst_37 : f32 to vector<8x256xf32>
    %65 = arith.maximumf %63, %64 : vector<8x256xf32>
    %66 = arith.mulf %56, %65 : vector<8x256xf32>
    %67 = vector.extract_strided_slice %37 {offsets = [4, 0], sizes = [1, 256], strides = [1, 1]} : vector<8x256xf32> to vector<1x256xf32>
    %68 = vector.broadcast %67 : vector<1x256xf32> to vector<8x256xf32>
    %69 = arith.addf %68, %47 : vector<8x256xf32>
    %70 = arith.subf %69, %66 : vector<8x256xf32>
    %cst_38 = arith.constant 9.99999993E-9 : f32
    %71 = vector.broadcast %cst_38 : f32 to vector<8x256xf32>
    %72 = arith.maximumf %70, %71 : vector<8x256xf32>
    %73 = arith.divf %66, %72 : vector<8x256xf32>
    %c0_39 = arith.constant 0 : index
    %c0_40 = arith.constant 0 : index
    %74 = vector.load %arg11[%c0_39, %c0_40] : memref<8x256xf32, #tpu.memory_space<vmem>>, vector<8x256xf32>
    tpu.vector_store %arg11[%c0_39, %c0_40], %73 {strides = array<i32>} : memref<8x256xf32, #tpu.memory_space<vmem>>, vector<8x256xf32>,
    return
  }
}

</mosaic_0001>

<bundles_post_ra>
// kernel: squeeze.31
= control target key start
LH: loop header
LB: loop body
LE: loop exit
PB: predicated region body
PF: predicated region fallthrough
CT: control target
= control target key end

     0   :  { %s530_s15 = smov 124   ;;  %s531_s16 = smov 116   ;;  %vm183_vm0 = vcmask 1041409   ;;  %vm185_vm1 = vcmask 31744   ;;  %vm386_vm2 = vcmask 1047556   ;;  %vm218_vm3 = vcmask 1048544   ;;  %s696_s0 = inlined_call_operand.vmem [shape: f32[1,9,4,4,4], index: 0, kind: input, shape index: {}]   ;;  %s697_s1 = inlined_call_operand.vmem [shape: f32[144,4], index: 1, kind: output, shape index: {}]  }
   0x1   :  { %v464_v0 = vld [vmem:[%s696_s0 + $0x88] sm:$0xf]  ;;  %v473_v1 = vld [vmem:[%s696_s0 + $0x64] sm:$0xf]  ;;  %v482_v2 = vld [vmem:[%s696_s0 + $0x40] sm:$0xf] }
   0x2   :  { %13 = vst [vmem:[#allocation1 + $0x110] sm:$0xf] %v464_v0  ;;  %58 = vst [vmem:[#allocation1 + $0xc8] sm:$0xf] %v473_v1  ;;  %v491_v3 = vld [vmem:[%s696_s0 + $0x1c] sm:$0xf] }
   0x3   :  { %103 = vst [vmem:[#allocation1 + $0x80] sm:$0xf] %v482_v2  ;;  %v465_v4 = vld [vmem:[%s696_s0 + $0x84] sm:$0xf]  ;;  %148 = vst [vmem:[#allocation1 + $0x38] sm:$0xf] %v491_v3 }
   0x4   :  { %18 = vst [vmem:[#allocation1 + $0x108] sm:$0xf] %v465_v4  ;;  %v474_v5 = vld [vmem:[%s696_s0 + $0x60] sm:$0xf]  ;;  %v483_v6 = vld [vmem:[%s696_s0 + $0x3c] sm:$0xf] }
   0x5   :  { %63 = vst [vmem:[#allocation1 + $0xc0] sm:$0xf] %v474_v5  ;;  %108 = vst [vmem:[#allocation1 + $0x78] sm:$0xf] %v483_v6  ;;  %v492_v7 = vld [vmem:[%s696_s0 + $0x18] sm:$0xf] }
   0x6   :  { %v466_v8 = vld [vmem:[%s696_s0 + $0x80] sm:$0xf]  ;;  %153 = vst [vmem:[#allocation1 + $0x30] sm:$0xf] %v492_v7  ;;  %v475_v9 = vld [vmem:[%s696_s0 + $0x5c] sm:$0xf] }
   0x7   :  { %23 = vst [vmem:[#allocation1 + $0x100] sm:$0xf] %v466_v8  ;;  %v484_v10 = vld [vmem:[%s696_s0 + $0x38] sm:$0xf]  ;;  %68 = vst [vmem:[#allocation1 + $0xb8] sm:$0xf] %v475_v9 }
   0x8   :  { %113 = vst [vmem:[#allocation1 + $0x70] sm:$0xf] %v484_v10  ;;  %v493_v11 = vld [vmem:[%s696_s0 + $0x14] sm:$0xf]  ;;  %v467_v12 = vld [vmem:[%s696_s0 + $0x7c] sm:$0xf] }
   0x9   :  { %158 = vst [vmem:[#allocation1 + $0x28] sm:$0xf] %v493_v11  ;;  %28 = vst [vmem:[#allocation1 + $0xf8] sm:$0xf] %v467_v12  ;;  %v476_v13 = vld [vmem:[%s696_s0 + $0x58] sm:$0xf] }
   0xa   :  { %v485_v14 = vld [vmem:[%s696_s0 + $0x34] sm:$0xf]  ;;  %73 = vst [vmem:[#allocation1 + $0xb0] sm:$0xf] %v476_v13  ;;  %v494_v15 = vld [vmem:[%s696_s0 + $0x10] sm:$0xf] }
   0xb   :  { %118 = vst [vmem:[#allocation1 + $0x68] sm:$0xf] %v485_v14  ;;  %v468_v16 = vld [vmem:[%s696_s0 + $0x78] sm:$0xf]  ;;  %163 = vst [vmem:[#allocation1 + $0x20] sm:$0xf] %v494_v15 }
   0xc   :  { %33 = vst [vmem:[#allocation1 + $0xf0] sm:$0xf] %v468_v16  ;;  %v477_v17 = vld [vmem:[%s696_s0 + $0x54] sm:$0xf]  ;;  %v486_v18 = vld [vmem:[%s696_s0 + $0x30] sm:$0xf] }
   0xd   :  { %v215_v19 = vld [vmem:[#allocation1 + $0x3b] ss:$72 sm:$0xf]   ;;  %v227_v20 = vld [vmem:[#allocation1 + $0x39] ss:$72 sm:$0xf]  }
   0xe   :  { %78 = vst [vmem:[#allocation1 + $0xa8] sm:$0xf] %v477_v17  ;;  %123 = vst [vmem:[#allocation1 + $0x60] sm:$0xf] %v486_v18  ;;  %216 = vrot.lane.b32.xlu0 %v215_v19, %s530_s15  ;;  %228 = vrot.lane.b32.xlu1 %v227_v20, %s531_s16  ;;  %s532_s17 = smov 120   ;;  %s533_s18 = smov 112  }
   0xf   :  { %v221_v21 = vld [vmem:[#allocation1 + $0x3a] ss:$72 sm:$0xf]   ;;  %v233_v22 = vld [vmem:[#allocation1 + $0x38] ss:$72 sm:$0xf]  }
  0x10   :  { %v239_v23 = vld [vmem:[#allocation1 + $0x33] ss:$72 sm:$0xf]   ;;  %v245_v24 = vld [vmem:[#allocation1 + $0x32] ss:$72 sm:$0xf]  }
  0x11   :  { %v251_v25 = vld [vmem:[#allocation1 + $0x31] ss:$72 sm:$0xf]   ;;  %v257_v26 = vld [vmem:[#allocation1 + $0x30] ss:$72 sm:$0xf]  }
  0x12   :  { %222 = vrot.lane.b32.xlu0 %v221_v21, %s532_s17  ;;  %234 = vrot.lane.b32.xlu1 %v233_v22, %s533_s18  ;;  %v495_v27 = vld [vmem:[%s696_s0 + $0xc] sm:$0xf]  ;;  %v469_v28 = vld [vmem:[%s696_s0 + $0x74] sm:$0xf]  ;;  %s534_s23 = smov 108   ;;  %s535_s24 = smov 104  }
  0x13   :  { %168 = vst [vmem:[#allocation1 + $0x18] sm:$0xf] %v495_v27  ;;  %38 = vst [vmem:[#allocation1 + $0xe8] sm:$0xf] %v469_v28  ;;  %v478_v29 = vld [vmem:[%s696_s0 + $0x50] sm:$0xf] }
  0x14   :  { %v487_v30 = vld [vmem:[%s696_s0 + $0x2c] sm:$0xf]  ;;  %83 = vst [vmem:[#allocation1 + $0xa0] sm:$0xf] %v478_v29  ;;  %v496_v31 = vld [vmem:[%s696_s0 + $0x8] sm:$0xf] }
  0x15   :  { %128 = vst [vmem:[#allocation1 + $0x58] sm:$0xf] %v487_v30  ;;  %v470_v32 = vld [vmem:[%s696_s0 + $0x70] sm:$0xf]  ;;  %173 = vst [vmem:[#allocation1 + $0x10] sm:$0xf] %v496_v31 }
  0x16   :  { %240 = vrot.lane.b32.xlu0 %v239_v23, %s534_s23  ;;  %246 = vrot.lane.b32.xlu1 %v245_v24, %s535_s24  ;;  %43 = vst [vmem:[#allocation1 + $0xe0] sm:$0xf] %v470_v32  ;;  %v479_v33 = vld [vmem:[%s696_s0 + $0x4c] sm:$0xf]  ;;  %v488_v34 = vld [vmem:[%s696_s0 + $0x28] sm:$0xf] }
  0x17   :  { %v263_v35 = vld [vmem:[#allocation1 + $0x2b] ss:$72 sm:$0xf]   ;;  %v269_v36 = vld [vmem:[#allocation1 + $0x2a] ss:$72 sm:$0xf]  }
  0x18   :  { %88 = vst [vmem:[#allocation1 + $0x98] sm:$0xf] %v479_v33  ;;  %133 = vst [vmem:[#allocation1 + $0x50] sm:$0xf] %v488_v34  ;;  %v497_v37 = vld [vmem:[%s696_s0 + $0x4] sm:$0xf] }
  0x19   :  { %v463_v38 = vld [vmem:[%s696_s0 + $0x8c] sm:$0xf]  ;;  %s536_s12 = smov 100   ;;  %s537_s13 = smov 96   ;;  %177 = vst [vmem:[#allocation1 + $0x8] sm:$0xf] %v497_v37 }
  0x1a   :  { %252 = vrot.lane.b32.xlu0 %v251_v25, %s536_s12  ;;  %258 = vrot.lane.b32.xlu1 %v257_v26, %s537_s13  ;;  %8 = vst [vmem:[#allocation1 + $0x118] sm:$0xf] %v463_v38  ;;  %v471_v39 = vld [vmem:[%s696_s0 + $0x6c] sm:$0xf]  ;;  %v472_v40 = vld [vmem:[%s696_s0 + $0x68] sm:$0xf] }
  0x1b   :  { %48 = vst [vmem:[#allocation1 + $0xd8] sm:$0xf] %v471_v39  ;;  %53 = vst [vmem:[#allocation1 + $0xd0] sm:$0xf] %v472_v40  ;;  %v480_v41 = vld [vmem:[%s696_s0 + $0x48] sm:$0xf] }
  0x1c   :  { %v481_v42 = vld [vmem:[%s696_s0 + $0x44] sm:$0xf]  ;;  %93 = vst [vmem:[#allocation1 + $0x90] sm:$0xf] %v480_v41  ;;  %v490_v44 = vld [vmem:[%s696_s0 + $0x20] sm:$0xf] }
  0x1d   :  { %v489_v43 = vld [vmem:[%s696_s0 + $0x24] sm:$0xf]  ;;  %98 = vst [vmem:[#allocation1 + $0x88] sm:$0xf] %v481_v42  ;;  %v178_v45 = vld [vmem:[%s696_s0] sm:$0xf] }
  0x1e   :  { %138 = vst [vmem:[#allocation1 + $0x48] sm:$0xf] %v489_v43  ;;  %143 = vst [vmem:[#allocation1 + $0x40] sm:$0xf] %v490_v44  ;;  %s538_s0 = smov 92   ;;  %s539_s28 = smov 88  }
  0x1f   :  { %179 = vst [vmem:[#allocation1] sm:$0xf] %v178_v45  ;;  %264 = vrot.lane.b32.xlu0 %v263_v35, %s538_s0  ;;  %270 = vrot.lane.b32.xlu1 %v269_v36, %s539_s28  ;;  %v275_v46 = vld [vmem:[#allocation1 + $0x29] ss:$72 sm:$0xf]   ;;  %s540_s29 = smov 84  }
  0x20   :  { %v281_v47 = vld [vmem:[#allocation1 + $0x28] ss:$72 sm:$0xf]   ;;  %s541_s30 = smov 80   ;;  %s542_s2 = smov 76   ;;  %vm224_vm4 = vcmask 1015744  }
  0x21   :  { %v287_v48 = vld [vmem:[#allocation1 + $0x23] ss:$72 sm:$0xf]   ;;  %v293_v49 = vld [vmem:[#allocation1 + $0x22] ss:$72 sm:$0xf]  }
  0x22   :  { %v299_v50 = vld [vmem:[#allocation1 + $0x21] ss:$72 sm:$0xf]   ;;  %s543_s3 = smov 72   ;;  %v199_v58 = vld [vmem:[#allocation1 + $0xcf] sm:$0x2]  }
  0x23   :  { %276 = vrot.lane.b32.xlu0 %v275_v46, %s540_s29  ;;  %282 = vrot.lane.b32.xlu1 %v281_v47, %s541_s30  ;;  %v305_v51 = vld [vmem:[#allocation1 + $0x20] ss:$72 sm:$0xf]   ;;  %s544_s4 = smov 68   ;;  %s545_s5 = smov 64   ;;  %vm230_vm5 = vcmask 982944  }
  0x24   :  { %v190_v56 = vld [vmem:[#allocation1 + $0x87] sm:$0x2]   ;;  %v197_v57 = vld [vmem:[#allocation1 + $0x90] sm:$0x1]   ;;  %v206_v61 = vld [vmem:[#allocation1 + $0xd8] sm:$0x1]  }
  0x25   :  { %v182_v53 = vld [vmem:[#allocation1 + $0x3f] sm:$0x2]   ;;  %v188_v54 = vld [vmem:[#allocation1 + $0x48] sm:$0x1]   ;;  %v201_v60 = vsel %vm183_vm0, %v199_v58, %v197_v57  ;;  %v208_v62 = vld [vmem:[#allocation1 + $0x117] sm:$0x2]  }
  0x26   :  { %v180_v52 = vld [vmem:[#allocation1] sm:$0x1]   ;;  %v192_v59 = vsel %vm183_vm0, %v190_v56, %v188_v54  ;;  %204 = vst.msk [vmem:[#allocation0 + $0x2] ss:$8 sm:$0x3] %vm185_vm1, %v201_v60   ;;  %v210_v63 = vsel %vm183_vm0, %v208_v62, %v206_v61  ;;  %s546_s6 = smov 60  }
  0x27   :  { %288 = vrot.lane.b32.xlu0 %v287_v48, %s542_s2  ;;  %294 = vrot.lane.b32.xlu1 %v293_v49, %s543_s3  ;;  %v184_v55 = vsel %vm183_vm0, %v182_v53, %v180_v52  ;;  %195 = vst.msk [vmem:[#allocation0 + $0x1] ss:$8 sm:$0x3] %vm185_vm1, %v192_v59   ;;  %v311_v0 = vld [vmem:[#allocation1 + $0x1b] ss:$72 sm:$0xf]  }
  0x28   :  { %186 = vst.msk [vmem:[#allocation0] ss:$8 sm:$0x3] %vm185_vm1, %v184_v55   ;;  %v317_v1 = vld [vmem:[#allocation1 + $0x1a] ss:$72 sm:$0xf]  }
  0x29   :  { %213 = vst.msk [vmem:[#allocation0 + $0x3] ss:$8 sm:$0x3] %vm185_vm1, %v210_v63   ;;  %s547_s7 = smov 56   ;;  %s548_s8 = smov 52   ;;  %vm236_vm6 = vcmask 950144  }
  0x2a   :  { %v323_v2 = vld [vmem:[#allocation1 + $0x19] ss:$72 sm:$0xf]   ;;  %v329_v3 = vld [vmem:[#allocation1 + $0x18] ss:$72 sm:$0xf]  }
  0x2b   :  { %300 = vrot.lane.b32.xlu0 %v299_v50, %s544_s4  ;;  %306 = vrot.lane.b32.xlu1 %v305_v51, %s545_s5  ;;  %s549_s9 = smov 48   ;;  %v335_v4 = vld [vmem:[#allocation1 + $0x13] ss:$72 sm:$0xf]   ;;  %s550_s10 = smov 44   ;;  %vm242_vm7 = vcmask 917344  }
  0x2c   :  { %v341_v5 = vld [vmem:[#allocation1 + $0x12] ss:$72 sm:$0xf]   ;;  %s551_s11 = smov 40   ;;  %s552_s12 = smov 36   ;;  %vm248_vm8 = vcmask 884544  }
  0x2d   :  { %v347_v6 = vld [vmem:[#allocation1 + $0x11] ss:$72 sm:$0xf]   ;;  %v353_v7 = vld [vmem:[#allocation1 + $0x10] ss:$72 sm:$0xf]  }
  0x2e   :  { %s553_s13 = smov 32   ;;  %v359_v8 = vld [vmem:[#allocation1 + $0xb] ss:$72 sm:$0xf]   ;;  %s554_s14 = smov 28   ;;  %vm254_vm9 = vcmask 851744  }
  0x2f   :  { %312 = vrot.lane.b32.xlu0 %v311_v0, %s546_s6  ;;  %318 = vrot.lane.b32.xlu1 %v317_v1, %s547_s7  ;;  %v365_v9 = vld [vmem:[#allocation1 + $0xa] ss:$72 sm:$0xf]   ;;  %s555_s15 = smov 24   ;;  %s556_s16 = smov 20   ;;  %vm260_vm10 = vcmask 818944  }
  0x30   :  { %v371_v10 = vld [vmem:[#allocation1 + $0x9] ss:$72 sm:$0xf]   ;;  %v377_v11 = vld [vmem:[#allocation1 + $0x8] ss:$72 sm:$0xf]  }
  0x31   :  { %v383_v12 = vld [vmem:[#allocation1 + $0x3] ss:$72 sm:$0xf]   ;;  %v395_v14 = vld [vmem:[#allocation1 + $0x2] ss:$72 sm:$0xf]  }
  0x32   :  { %v385_v13 = vld [vmem:[#allocation1 - $0xdd] ss:$72 sm:$0xf0]   ;;  %v397_v15 = vld [vmem:[#allocation1 - $0xde] ss:$72 sm:$0xf0]  }
  0x33   :  { %324 = vrot.lane.b32.xlu0 %v323_v2, %s548_s8  ;;  %330 = vrot.lane.b32.xlu1 %v329_v3, %s549_s9  ;;  %s557_s17 = smov 16   ;;  %v387_v16 = vsel %vm386_vm2, %v385_v13, %v383_v12  ;;  %v399_v17 = vsel %vm386_vm2, %v397_v15, %v395_v14  ;;  %v407_v18 = vld [vmem:[#allocation1 + $0x1] ss:$72 sm:$0xf]   ;;  %s558_s18 = smov 12   ;;  %vm266_vm11 = vcmask 786144  }
  0x34   :  { %v409_v19 = vld [vmem:[#allocation1 - $0xdf] ss:$72 sm:$0xf0]   ;;  %s559_s19 = smov 8   ;;  %s560_s20 = smov 4   ;;  %vm272_vm12 = vcmask 753344  }
  0x35   :  { %v411_v20 = vsel %vm386_vm2, %v409_v19, %v407_v18  ;;  %vm278_vm13 = vcmask 720544   ;;  %vm284_vm14 = vcmask 687744   ;;  %vm290_vm15 = vcmask 654944  }
  0x36   :  { %vm296_vm0 = vcmask 622144   ;;  %vm302_vm1 = vcmask 589344   ;;  %vm308_vm2 = vcmask 556544  }
  0x37   :  { %336 = vrot.lane.b32.xlu0 %v335_v4, %s550_s10  ;;  %342 = vrot.lane.b32.xlu1 %v341_v5, %s551_s11 }
  0x3b   :  { %348 = vrot.lane.b32.xlu0 %v347_v6, %s552_s12  ;;  %354 = vrot.lane.b32.xlu1 %v353_v7, %s553_s13 }
  0x3f   :  { %360 = vrot.lane.b32.xlu0 %v359_v8, %s554_s14  ;;  %366 = vrot.lane.b32.xlu1 %v365_v9, %s555_s15 }
  0x43   :  { %372 = vrot.lane.b32.xlu0 %v371_v10, %s556_s16  ;;  %378 = vrot.lane.b32.xlu1 %v377_v11, %s557_s17 }
  0x47   :  { %388 = vrot.lane.b32.xlu0 %v387_v16, %s558_s18  ;;  %400 = vrot.lane.b32.xlu1 %v399_v17, %s559_s19 }
  0x4b   :  { %412 = vrot.lane.b32.xlu0 %v411_v20, %s560_s20 }
  0x80   :  { %v217_v21 = vpop.permute.xlu0 %216   ;;  %v229_v22 = vpop.permute.xlu1 %228  }
  0x81   :  { %219 = vst.msk [vmem:[#allocation0] sm:$0xf] %vm218_vm3, %v217_v21   ;;  %vm314_vm3 = vcmask 523744  }
  0x84   :  { %v223_v23 = vpop.permute.xlu0 %222   ;;  %v235_v24 = vpop.permute.xlu1 %234  }
  0x85   :  { %225 = vst.msk [vmem:[#allocation0] sm:$0xf] %vm224_vm4, %v223_v23   ;;  %vm320_vm4 = vcmask 490944  }
  0x86   :  { %231 = vst.msk [vmem:[#allocation0] sm:$0xf] %vm230_vm5, %v229_v22   ;;  %vm326_vm5 = vcmask 458144  }
  0x87   :  { %237 = vst.msk [vmem:[#allocation0] sm:$0xf] %vm236_vm6, %v235_v24   ;;  %vm332_vm6 = vcmask 425344  }
  0x88   :  { %v241_v25 = vpop.permute.xlu0 %240   ;;  %v247_v26 = vpop.permute.xlu1 %246  }
  0x89   :  { %243 = vst.msk [vmem:[#allocation0] sm:$0xf] %vm242_vm7, %v241_v25   ;;  %vm338_vm7 = vcmask 392544  }
  0x8a   :  { %249 = vst.msk [vmem:[#allocation0] sm:$0xf] %vm248_vm8, %v247_v26   ;;  %vm344_vm8 = vcmask 359744  }
  0x8c   :  { %v253_v27 = vpop.permute.xlu0 %252   ;;  %v259_v28 = vpop.permute.xlu1 %258  }
  0x8d   :  { %255 = vst.msk [vmem:[#allocation0] sm:$0xf] %vm254_vm9, %v253_v27   ;;  %vm350_vm9 = vcmask 326944  }
  0x8e   :  { %261 = vst.msk [vmem:[#allocation0] sm:$0xf] %vm260_vm10, %v259_v28   ;;  %vm356_vm10 = vcmask 294144  }
  0x91   :  { %v265_v29 = vpop.permute.xlu0 %264   ;;  %v271_v30 = vpop.permute.xlu1 %270  }
  0x92   :  { %267 = vst.msk [vmem:[#allocation0] sm:$0xf] %vm266_vm11, %v265_v29   ;;  %vm362_vm11 = vcmask 261344  }
  0x93   :  { %273 = vst.msk [vmem:[#allocation0] sm:$0xf] %vm272_vm12, %v271_v30   ;;  %vm368_vm12 = vcmask 228544  }
  0x95   :  { %v277_v31 = vpop.permute.xlu0 %276   ;;  %v283_v32 = vpop.permute.xlu1 %282  }
  0x96   :  { %279 = vst.msk [vmem:[#allocation0] sm:$0xf] %vm278_vm13, %v277_v31   ;;  %vm374_vm13 = vcmask 195744  }
  0x97   :  { %285 = vst.msk [vmem:[#allocation0] sm:$0xf] %vm284_vm14, %v283_v32   ;;  %vm380_vm14 = vcmask 162944  }
  0x99   :  { %v289_v33 = vpop.permute.xlu0 %288   ;;  %v295_v34 = vpop.permute.xlu1 %294  }
  0x9a   :  { %291 = vst.msk [vmem:[#allocation0] sm:$0xf] %vm290_vm15, %v289_v33   ;;  %vm390_vm15 = vcmask 130144  }
  0x9b   :  { %297 = vst.msk [vmem:[#allocation0] sm:$0xf] %vm296_vm0, %v295_v34   ;;  %vm402_vm0 = vcmask 97344  }
  0x9d   :  { %v301_v35 = vpop.permute.xlu0 %300   ;;  %v307_v36 = vpop.permute.xlu1 %306  }
  0x9e   :  { %303 = vst.msk [vmem:[#allocation0] sm:$0xf] %vm302_vm1, %v301_v35   ;;  %vm414_vm1 = vcmask 64544  }
  0x9f   :  { %309 = vst.msk [vmem:[#allocation0] sm:$0xf] %vm308_vm2, %v307_v36  }
  0xa1   :  { %v313_v37 = vpop.permute.xlu0 %312   ;;  %v319_v38 = vpop.permute.xlu1 %318  }
  0xa2   :  { %315 = vst.msk [vmem:[#allocation0] sm:$0xf] %vm314_vm3, %v313_v37  }
  0xa3   :  { %321 = vst.msk [vmem:[#allocation0] sm:$0xf] %vm320_vm4, %v319_v38  }
  0xa5   :  { %v325_v39 = vpop.permute.xlu0 %324   ;;  %v331_v40 = vpop.permute.xlu1 %330  }
  0xa6   :  { %327 = vst.msk [vmem:[#allocation0] sm:$0xf] %vm326_vm5, %v325_v39  }
  0xa7   :  { %333 = vst.msk [vmem:[#allocation0] sm:$0xf] %vm332_vm6, %v331_v40  }
  0xa9   :  { %v337_v41 = vpop.permute.xlu0 %336   ;;  %v343_v42 = vpop.permute.xlu1 %342  }
  0xaa   :  { %339 = vst.msk [vmem:[#allocation0] sm:$0xf] %vm338_vm7, %v337_v41  }
  0xab   :  { %345 = vst.msk [vmem:[#allocation0] sm:$0xf] %vm344_vm8, %v343_v42  }
  0xad   :  { %v349_v43 = vpop.permute.xlu0 %348   ;;  %v355_v44 = vpop.permute.xlu1 %354  }
  0xae   :  { %351 = vst.msk [vmem:[#allocation0] sm:$0xf] %vm350_vm9, %v349_v43  }
  0xaf   :  { %357 = vst.msk [vmem:[#allocation0] sm:$0xf] %vm356_vm10, %v355_v44  }
  0xb1   :  { %v361_v45 = vpop.permute.xlu0 %360   ;;  %v367_v46 = vpop.permute.xlu1 %366  }
  0xb2   :  { %363 = vst.msk [vmem:[#allocation0] sm:$0xf] %vm362_vm11, %v361_v45  }
  0xb3   :  { %369 = vst.msk [vmem:[#allocation0] sm:$0xf] %vm368_vm12, %v367_v46  }
  0xb5   :  { %v373_v47 = vpop.permute.xlu0 %372   ;;  %v379_v48 = vpop.permute.xlu1 %378  }
  0xb6   :  { %375 = vst.msk [vmem:[#allocation0] sm:$0xf] %vm374_vm13, %v373_v47  }
  0xb7   :  { %381 = vst.msk [vmem:[#allocation0] sm:$0xf] %vm380_vm14, %v379_v48  }
  0xb9   :  { %v389_v49 = vpop.permute.xlu0 %388   ;;  %v401_v50 = vpop.permute.xlu1 %400  }
  0xba   :  { %391 = vst.msk [vmem:[#allocation0] sm:$0xf] %vm390_vm15, %v389_v49   ;;  %393 = vst.msk [vmem:[#allocation0 + $0x4] sm:$0xf0] %vm390_vm15, %v389_v49  }
  0xbb   :  { %403 = vst.msk [vmem:[#allocation0] sm:$0xf] %vm402_vm0, %v401_v50   ;;  %405 = vst.msk [vmem:[#allocation0 + $0x4] sm:$0xf0] %vm402_vm0, %v401_v50  }
  0xbd   :  { %v413_v51 = vpop.permute.xlu0 %412  }
  0xbe   :  { %415 = vst.msk [vmem:[#allocation0] sm:$0xf] %vm414_vm1, %v413_v51   ;;  %417 = vst.msk [vmem:[#allocation0 + $0x4] sm:$0xf0] %vm414_vm1, %v413_v51  }
  0xc5   :  { %v421_v52 = vld [vmem:[#allocation0] sm:$0xf]  ;;  %v425_v53 = vld [vmem:[#allocation0 + $0x8] sm:$0xf] }
  0xc6   :  { %423 = vst [vmem:[%s697_s1] sm:$0xf] %v421_v52  ;;  %498 = vst [vmem:[%s697_s1 + $0x4] sm:$0xf] %v425_v53 }

// kernel: single_stage_detector_forward.1
= control target key start
LH: loop header
LB: loop body
LE: loop exit
PB: predicated region body
PF: predicated region fallthrough
CT: control target
= control target key end

     0   :  { %vm59_vm0 = vcmask 1040384   ;;  %vm60_vm1 = vcmask 1041408   ;;  %v426_v1 = vmov 65535   ;;  %vm52_vm2 = vcmask 23552   ;;  %s582_s1 = inlined_call_operand.vmem [shape: bf16[3,32], index: 1, kind: input, shape index: {}]   ;;  %s583_s0 = inlined_call_operand.vmem [shape: f32[32,3], index: 0, kind: input, shape index: {}]   ;;  %s584_s3 = inlined_call_operand.vmem [shape: bf16[32,128], index: 3, kind: input, shape index: {}]   ;;  %s585_s2 = inlined_call_operand.vmem [shape: f32[1,32], index: 2, kind: input, shape index: {}]   ;;  %s586_s8 = inlined_call_operand.vmem [shape: f32[8,256], index: 8, kind: input, shape index: {}]   ;;  %s587_s9 = inlined_call_operand.vmem [shape: f32[5,8,256], index: 9, kind: input, shape index: {}]   ;;  %s588_s11 = inlined_call_operand.vmem [shape: f32[8,256], index: 11, kind: output, shape index: {1}]   ;;  %s589_s4 = inlined_call_operand.vmem [shape: f32[1,128], index: 4, kind: input, shape index: {}]   ;;  %s590_s7 = inlined_call_operand.vmem [shape: f32[1,128], index: 7, kind: input, shape index: {}]   ;;  %s591_s5 = inlined_call_operand.vmem [shape: f32[1,128], index: 5, kind: input, shape index: {}]   ;;  %s592_s6 = inlined_call_operand.vmem [shape: f32[1,128], index: 6, kind: input, shape index: {}]   ;;  %s593_s10 = inlined_call_operand.vmem [shape: f32[32,128], index: 10, kind: output, shape index: {0}]  }
   0x1   :  { %v44_v0 = vld [vmem:[%s582_s1] sm:$0x3]  ;;  %v61_v2 = vsel %vm59_vm0, 4294967295, %v426_v1  ;;  %v39_v4 = vld [vmem:[%s583_s0 + $0x8] sm:$0xff]  ;;  %v40_v7 = vld [vmem:[%s583_s0 + $0x10] sm:$0xff]  ;;  %vm152_vm7 = vcmask 261120   ;;  %v257_v32 = vlaneseq }
   0x2   :  { %v38_v3 = vld [vmem:[%s583_s0] sm:$0xff]  ;;  %v62_v5 = vsel %vm60_vm1, %v61_v2, 0  ;;  %v41_v8 = vld [vmem:[%s583_s0 + $0x18] sm:$0xff]  ;;  %v405_v12 = vld [vmem:[%s584_s3 + $0x8] sm:$0xff]  }
   0x3   :  { %v42_v6 = vpack.c.bf16 %v39_v4, %v38_v3  ;;  %v64_v9 = vand.u32 %v62_v5, %v44_v0  ;;  %v43_v10 = vpack.c.bf16 %v41_v8, %v40_v7  ;;  %v404_v11 = vld [vmem:[%s584_s3] sm:$0xff]   ;;  %v258_v33 = vshrl.u32 %v257_v32, 7  ;;  %v271_v39 = vld [vmem:[%s586_s8 + $0x8] sm:$0xff]  ;;  %v374_v46 = vld [vmem:[%s587_s9 + $0x10] sm:$0xff] }
   0x4   :  { %395 = vmatprep.subr.bf16.mxu1 %v404_v11  ;;  %v364_v13 = vld [vmem:[%s585_s2] ss:$0 sm:$0xff]  ;;  %v273_v45 = vld [vmem:[%s587_s9 + $0x8] sm:$0xff]  ;;  %v375_v51 = vld [vmem:[%s587_s9 + $0x18] sm:$0xff] }
   0x5   :  { %391 = vmatprep.mubr.msk.bf16.mxu0 %vm52_vm2, %v42_v6  ;;  %389 = vmatprep.subr.bf16.mxu0 %v64_v9  ;;  %v511_v34 = vsub.s32 0, %v258_v33  ;;  %v288_v35 = vsub.s32 2, %v258_v33  ;;  %v312_v36 = vsub.s32 3, %v258_v33  ;;  %v322_v37 = vsub.s32 1, %v258_v33  ;;  %v270_v38 = vld [vmem:[%s586_s8] sm:$0xff]  ;;  %v377_v53 = vld [vmem:[%s587_s9 + $0x28] sm:$0xff] }
   0x6   :  { %390 = vmatpush3.bf16.msra.mxu0 %v64_v9  ;;  %396 = vmatpush3.bf16.msra.mxu1 %v404_v11  ;;  %v272_v44 = vld [vmem:[%s587_s9] sm:$0xff]  ;;  %v378_v56 = vld [vmem:[%s587_s9 + $0x30] sm:$0xff]  ;;  %v379_v57 = vld [vmem:[%s587_s9 + $0x38] sm:$0xff]  ;;  %v338_v0 = vsub.s32 4, %v258_v33 }
   0x7   :  { %397 = vmatprep.subr.bf16.mxu1 %v405_v12  ;;  %v289_v40 = vrot.slane %v270_v38, %v288_v35  ;;  %v293_v41 = vrot.slane %v271_v39, %v288_v35  ;;  %v299_v42 = vrot.slane %v270_v38, %v511_v34  ;;  %v303_v43 = vrot.slane %v271_v39, %v511_v34  ;;  %v376_v52 = vld [vmem:[%s587_s9 + $0x20] sm:$0xff]  ;;  %v381_v8 = vld [vmem:[%s587_s9 + $0x48] sm:$0xff] }
   0x8   :  { %v313_v47 = vrot.slane %v270_v38, %v312_v36  ;;  %v317_v48 = vrot.slane %v271_v39, %v312_v36  ;;  %v323_v49 = vrot.slane %v270_v38, %v322_v37  ;;  %v327_v50 = vrot.slane %v271_v39, %v322_v37  ;;  %v380_v7 = vld [vmem:[%s587_s9 + $0x40] sm:$0xff] }
   0x9   :  { %392 = vmatmul.mubr.msk.bf16.vlgmr.msra.gmra.mrb[0].mxu0 %vm52_vm2, %v43_v10  ;;  %v304_v54 = vmax.f32 %v272_v44, %v299_v42  ;;  %v305_v55 = vmax.f32 %v273_v45, %v303_v43  ;;  %v294_v58 = vmin.f32 %v376_v52, %v289_v40  ;;  %v295_v59 = vmin.f32 %v377_v53, %v293_v41  ;;  %v372_v53 = vld [vmem:[%s591_s5] ss:$0 sm:$0xff] }
   0xa   :  { %398 = vmatpush3.bf16.msra.mxu1 %v405_v12  ;;  %v328_v60 = vmax.f32 %v374_v46, %v323_v49  ;;  %v329_v61 = vmax.f32 %v375_v51, %v327_v50  ;;  %v318_v62 = vmin.f32 %v378_v56, %v313_v47  ;;  %v319_v63 = vmin.f32 %v379_v57, %v317_v48  ;;  %v254_v51 = vld [vmem:[%s590_s7] sm:$0x1] }
   0xb   :  { %v306_v1 = vsub.f32 %v294_v58, %v304_v54  ;;  %v307_v2 = vsub.f32 %v295_v59, %v305_v55  ;;  %v339_v5 = vrot.slane %v270_v38, %v338_v0  ;;  %v343_v6 = vrot.slane %v271_v39, %v338_v0  ;;  %v373_v54 = vld [vmem:[%s592_s6] ss:$0 sm:$0xff] }
   0xc   :  { %v330_v3 = vsub.f32 %v318_v62, %v328_v60  ;;  %v331_v4 = vsub.f32 %v319_v63, %v329_v61  ;;  %v255_v52 = vmul.f32 0.5, %v254_v51 }
   0xd   :  { %v308_v9 = vmax.f32 %v306_v1, 0.0  ;;  %v309_v10 = vmax.f32 %v307_v2, 0.0 }
   0xe   :  { %v332_v11 = vmax.f32 %v330_v3, 0.0  ;;  %v333_v12 = vmax.f32 %v331_v4, 0.0  ;;  %v260_v59 = vrot.slane %v255_v52, %v511_v34 }
  0xdc   :  { %v393_v14 = vpop.f32.mrb[0].mxu0 }
  0xdd   :  { %v109_v15 = vadd.f32 %v393_v14, %v364_v13  ;;  %v100_v16 = vpop.f32.mrb[1].mxu0  ;;  %v345_v14 = vadd.f32 %v381_v8, %v343_v6 }
  0xde   :  { %v101_v17 = vadd.f32 %v364_v13, %v100_v16  ;;  %v394_v18 = vpop.f32.mrb[2].mxu0  ;;  %v335_v16 = vmul.f32 %v333_v12, %v309_v10 }
  0xdf   :  { %v121_v19 = vmul.f32 0.01, %v109_v15  ;;  %v112_v20 = vadd.f32 %v394_v18, %v364_v13  ;;  %v103_v21 = vpop.f32.mrb[3].mxu0  ;;  %vm117_vm3 = vcmp.gt.f32.partialorder %v109_v15, 0.0 }
  0xe0   :  { %v119_v22 = vmul.f32 0.01, %v101_v17  ;;  %v104_v23 = vadd.f32 %v364_v13, %v103_v21  ;;  %vm115_vm5 = vcmp.gt.f32.partialorder %v101_v17, 0.0  ;;  %v344_v13 = vadd.f32 %v380_v7, %v339_v5 }
  0xe1   :  { %vm118_vm4 = vcmp.gt.f32.partialorder %v112_v20, 0.0  ;;  %v122_v24 = vmul.f32 0.01, %v112_v20  ;;  %v125_v26 = vsel %vm117_vm3, %v109_v15, %v121_v19  ;;  %v334_v15 = vmul.f32 %v332_v11, %v308_v9 }
  0xe2   :  { %v120_v25 = vmul.f32 0.01, %v104_v23  ;;  %vm116_vm6 = vcmp.gt.f32.partialorder %v104_v23, 0.0  ;;  %v123_v29 = vsel %vm115_vm5, %v101_v17, %v119_v22  ;;  %v347_v18 = vsub.f32 %v345_v14, %v335_v16 }
  0xe3   :  { %v126_v27 = vsel %vm118_vm4, %v112_v20, %v122_v24  ;;  %v346_v17 = vsub.f32 %v344_v13, %v334_v15 }
  0xe4   :  { %v128_v28 = vpack.c.bf16 %v126_v27, %v125_v26  ;;  %v124_v30 = vsel %vm116_vm6, %v104_v23, %v120_v25  ;;  %v349_v20 = vmax.f32 %v347_v18, 1e-08  ;;  %v367_v25 = vld [vmem:[%s589_s4] ss:$0 sm:$0xff] }
  0xe5   :  { %v127_v31 = vpack.c.bf16 %v124_v30, %v123_v29  ;;  %v348_v19 = vmax.f32 %v346_v17, 1e-08 }
  0xe7   :  { %399 = vmatprep.mubr.msk.bf16.mxu1 %vm152_vm7, %v127_v31  ;;  %406 = vrcp.f32 %v348_v19 }
  0xe8   :  { %400 = vmatmul.mubr.msk.bf16.vlgmr.msra.gmra.mrb[0].mxu1 %vm152_vm7, %v128_v28  ;;  %408 = vrcp.f32 %v349_v20 }
  0xf1   :  { %v407_v21 = vpop.eup %406 }
  0xf2   :  { %v409_v22 = vpop.eup %408  ;;  %v351_v23 = vmul.f32 %v407_v21, %v334_v15 }
  0xf3   :  { %v353_v24 = vmul.f32 %v409_v22, %v335_v16 }
  0xf4   :  { %354 = vst [vmem:[%s588_s11] sm:$0xff] %v351_v23 }
  0xf5   :  { %355 = vst [vmem:[%s588_s11 + $0x8] sm:$0xff] %v353_v24 }
 0x1bb   :  { %v401_v26 = vpop.f32.mrb[0].mxu1 }
 0x1bc   :  { %v202_v27 = vadd.f32 %v401_v26, %v367_v25  ;;  %v193_v28 = vpop.f32.mrb[1].mxu1 }
 0x1bd   :  { %v194_v29 = vadd.f32 %v367_v25, %v193_v28  ;;  %v402_v30 = vpop.f32.mrb[2].mxu1 }
 0x1be   :  { %v210_v31 = vsub.f32 0.0, %v202_v27  ;;  %v205_v32 = vadd.f32 %v402_v30, %v367_v25  ;;  %v196_v33 = vpop.f32.mrb[3].mxu1  ;;  %v237_v57 = vmul.f32 %v372_v53, %v202_v27 }
 0x1bf   :  { %v208_v35 = vsub.f32 0.0, %v194_v29  ;;  %v197_v36 = vadd.f32 %v367_v25, %v196_v33  ;;  %v235_v61 = vmul.f32 %v372_v53, %v194_v29 }
 0x1c0   :  { %v216_v37 = vmul.f32 1.442695, %v210_v31  ;;  %v211_v38 = vsub.f32 0.0, %v205_v32  ;;  %v238_v1 = vmul.f32 %v372_v53, %v205_v32 }
 0x1c1   :  { %v212_v39 = vmul.f32 1.442695, %v208_v35  ;;  %v209_v40 = vsub.f32 0.0, %v197_v36  ;;  %v236_v4 = vmul.f32 %v372_v53, %v197_v36 }
 0x1c2   :  { %410 = vpow2.f32 %v216_v37  ;;  %v218_v41 = vmul.f32 1.442695, %v211_v38 }
 0x1c3   :  { %412 = vpow2.f32 %v212_v39  ;;  %v214_v42 = vmul.f32 1.442695, %v209_v40 }
 0x1c4   :  { %414 = vpow2.f32 %v218_v41 }
 0x1c5   :  { %416 = vpow2.f32 %v214_v42 }
 0x1cc   :  { %v411_v43 = vpop.eup %410 }
 0x1cd   :  { %v413_v44 = vpop.eup %412  ;;  %v222_v45 = vadd.f32 1.0, %v411_v43 }
 0x1ce   :  { %v415_v46 = vpop.eup %414  ;;  %v220_v47 = vadd.f32 1.0, %v413_v44 }
 0x1cf   :  { %v417_v48 = vpop.eup %416  ;;  %418 = vrcp.f32 %v222_v45  ;;  %v223_v49 = vadd.f32 1.0, %v415_v46 }
 0x1d0   :  { %420 = vrcp.f32 %v220_v47  ;;  %v221_v50 = vadd.f32 1.0, %v417_v48 }
 0x1d1   :  { %422 = vrcp.f32 %v223_v49 }
 0x1d2   :  { %424 = vrcp.f32 %v221_v50 }
 0x1d9   :  { %v419_v55 = vpop.eup %418 }
 0x1da   :  { %v421_v56 = vpop.eup %420  ;;  %v248_v58 = vmul.f32 %v419_v55, %v373_v54 }
 0x1db   :  { %v423_v60 = vpop.eup %422  ;;  %v246_v62 = vmul.f32 %v421_v56, %v373_v54 }
 0x1dc   :  { %v425_v63 = vpop.eup %424  ;;  %v252_v0 = vadd.f32 %v248_v58, %v237_v57  ;;  %v249_v2 = vmul.f32 %v423_v60, %v373_v54 }
 0x1dd   :  { %v250_v3 = vadd.f32 %v246_v62, %v235_v61  ;;  %v247_v5 = vmul.f32 %v425_v63, %v373_v54 }
 0x1de   :  { %v264_v6 = vsub.f32 %v252_v0, %v260_v59  ;;  %v253_v7 = vadd.f32 %v249_v2, %v238_v1 }
 0x1df   :  { %v262_v8 = vsub.f32 %v250_v3, %v260_v59  ;;  %v251_v9 = vadd.f32 %v247_v5, %v236_v4 }
 0x1e0   :  { %268 = vst [vmem:[%s593_s10 + $0x10] sm:$0xff] %v264_v6  ;;  %v265_v10 = vsub.f32 %v253_v7, %v260_v59 }
 0x1e1   :  { %266 = vst [vmem:[%s593_s10] sm:$0xff] %v262_v8  ;;  %v263_v34 = vsub.f32 %v251_v9, %v260_v59 }
 0x1e2   :  { %269 = vst [vmem:[%s593_s10 + $0x18] sm:$0xff] %v265_v10 }
 0x1e3   :  { %267 = vst [vmem:[%s593_s10 + $0x8] sm:$0xff] %v263_v34 }

</bundles_post_ra>
